<compile_context>
chip_gen: v5e
topology: v5e:2x2
jax: 0.10.0
libtpu: 0.0.40
codegen_flags: <defaults>
</compile_context>

<pallas_src>
import jax
import jax.numpy as jnp
import numpy as np
from jax.experimental import pallas as pl
from jax.experimental.pallas import tpu as pltpu


def _cdiv(a, b):
    return (a + b - 1) // b


def _round_up(x, m):
    return _cdiv(x, m) * m


# Per-block DMA cap (bytes).  Only the prediction stream is large, so two
# pipeline buffers of 4 MiB (~8 MiB) plus the tiny stat/output blocks fit the
# 32 MiB scoped-VMEM budget requested below on every generation.
_MAX_BLOCK_BYTES = 4 * 1024 * 1024
_VMEM_LIMIT_BYTES = 32 * 1024 * 1024


def _make_layer_kernel(r, s, tile_r, tile_s):
    """Build the per-layer kernel with the true R, S baked in statically."""
    inv_s = 1.0 / s
    # torch's unbiased std returns NaN for S == 1; match that instead of crashing.
    inv_sm1 = (1.0 / (s - 1)) if s > 1 else float("nan")
    mask_cols = (s % tile_s) != 0     # spatial tail tile has junk columns
    mask_rows = (r % tile_r) != 0     # last row tile has junk rows

    def kernel(p_ref, tmean_ref, tstd_ref, out_ref, sum_q, ssq_q):
        i = pl.program_id(0)          # row tile   ("parallel")
        j = pl.program_id(1)          # spatial tile ("arbitrary" reduction)

        @pl.when(j == 0)
        def _():
            sum_q[...] = jnp.zeros_like(sum_q)
            ssq_q[...] = jnp.zeros_like(ssq_q)

        t_mean = tmean_ref[...].astype(jnp.float32)            # (tile_r, 1)
        # Shifted one-pass statistics: accumulate sums of (p - t_mean).  The
        # mean difference then needs no cancellation-prone subtraction and the
        # variance is far less sensitive to large common offsets.
        q = p_ref[...].astype(jnp.float32) - t_mean             # (tile_r, tile_s)
        if mask_cols:
            col = jax.lax.broadcasted_iota(jnp.int32, q.shape, 1)
            q = jnp.where(col < (s - j * tile_s), q, 0.0)        # zero the tail cols
        sum_q[...] += jnp.sum(q, axis=-1, keepdims=True)
        ssq_q[...] += jnp.sum(q * q, axis=-1, keepdims=True)

        @pl.when(j == pl.num_programs(1) - 1)
        def _():
            dm = sum_q[...] * inv_s                              # == p_mean - t_mean
            p_var = (ssq_q[...] - sum_q[...] * dm) * inv_sm1     # unbiased variance
            p_std = jnp.sqrt(jnp.maximum(p_var, 0.0))
            ds = p_std - tstd_ref[...].astype(jnp.float32)
            per_row = dm * dm + ds * ds                          # (tile_r, 1)
            if mask_rows:
                row = jax.lax.broadcasted_iota(jnp.int32, per_row.shape, 0)
                per_row = jnp.where(row < (r - i * tile_r), per_row, 0.0)
            tile_sum = jnp.sum(per_row, keepdims=True)           # (1, 1)
            # Lane-dense, unmasked (8, 128) store of the row-tile partial sum.
            out_ref[...] = jnp.broadcast_to(tile_sum, out_ref.shape)

    return kernel


def _style_bn_layer_term(pred, t_mean, t_std, *, max_block_bytes=_MAX_BLOCK_BYTES):
    """Sum over (n, c) of (p_mean - t_mean)^2 + (p_std - t_std)^2 for one layer."""
    n, c, h, w = pred.shape
    r, s = n * c, h * w
    p2 = pred.reshape(r, s)                                   # S is the lane axis
    tm2 = t_mean.reshape(r, 1).astype(jnp.float32)
    tsd2 = t_std.reshape(r, 1).astype(jnp.float32)

    itemsize = jnp.dtype(pred.dtype).itemsize
    # dtype-aware sublane alignment: (8,128) f32 / (16,128) bf16 / (32,128) int8-fp8.
    sub_align = max(8, 32 // itemsize)
    if r <= sub_align:
        tile_r = r                       # block == full row extent (always legal)
    else:
        # Aim for >= 2 row tiles so the "parallel" axis shards across both
        # TensorCores on v7x; cap at 256 rows per tile.
        tile_r = min(256, _round_up(_cdiv(r, 2), sub_align))
    nr = _cdiv(r, tile_r)

    # Byte-based spatial block cap; keep it a multiple of 128 lanes.
    lanes_cap = max(128, (max_block_bytes // itemsize // tile_r) // 128 * 128)
    if s <= lanes_cap:
        tile_s, ns = s, 1                # single full-extent spatial block
    else:
        tile_s, ns = lanes_cap, _cdiv(s, lanes_cap)   # tail tile masked in-kernel

    cost = pl.CostEstimate(
        flops=5 * r * s,
        transcendentals=r,
        bytes_accessed=r * s * itemsize + 2 * r * 4 + nr * 8 * 128 * 4,
    )

    out = pl.pallas_call(
        _make_layer_kernel(r, s, tile_r, tile_s),
        out_shape=jax.ShapeDtypeStruct((nr * 8, 128), jnp.float32),
        grid_spec=pltpu.PrefetchScalarGridSpec(
            num_scalar_prefetch=0,
            grid=(nr, ns),
            in_specs=[
                pl.BlockSpec((tile_r, tile_s), lambda i, j: (i, j)),
                pl.BlockSpec((tile_r, 1), lambda i, j: (i, 0)),
                pl.BlockSpec((tile_r, 1), lambda i, j: (i, 0)),
            ],
            out_specs=pl.BlockSpec((8, 128), lambda i, j: (i, 0)),
            scratch_shapes=[
                pltpu.VMEM((tile_r, 1), jnp.float32),   # sum of (p - t_mean)
                pltpu.VMEM((tile_r, 1), jnp.float32),   # sum of (p - t_mean)^2
            ],
        ),
        compiler_params=pltpu.CompilerParams(
            dimension_semantics=("parallel", "arbitrary"),
            vmem_limit_bytes=_VMEM_LIMIT_BYTES,
        ),
        cost_estimate=cost,
    )(p2, tm2, tsd2)

    # All 8*128 lanes of each row-tile output block hold identical partial sums.
    return jnp.sum(out) * (1.0 / (8.0 * 128.0))


class StyleLossBN:
    """JAX/Pallas equivalent of the PyTorch StyleLoss_BN module.

    Target mean/std are precomputed once at construction (like the PyTorch
    module), so each forward pass only streams the prediction features.
    """

    def __init__(self, targets, weights=None):
        self.targets_mean = [jnp.mean(t, axis=(-2, -1)) for t in targets]
        self.targets_std = [jnp.std(t, axis=(-2, -1), ddof=1) for t in targets]
        self.weights = [1.0] * len(targets) if weights is None else list(weights)

    def __call__(self, preds):
        # TODO(synk): fuse all layers into one pallas_call (scalar-prefetch row
        # offset / per-layer inv_S tables) to remove per-layer dispatch overhead
        # when there are many tiny feature maps; kept per-layer for generality.
        loss = jnp.float32(0.0)
        for p, tm, tsd, w in zip(preds, self.targets_mean, self.targets_std,
                                 self.weights):
            c = p.shape[1]                       # p_mean.shape[-1] == C for NCHW
            term = _style_bn_layer_term(p, tm, tsd)
            loss = loss + term * jnp.float32(w / c)
        return loss


def _reference_loss(preds, targets, weights):
    """Plain-JAX reference reproducing the PyTorch forward exactly."""
    loss = jnp.float32(0.0)
    for p, t, w in zip(preds, targets, weights):
        p_mean = p.mean(axis=(-2, -1))
        t_mean = t.mean(axis=(-2, -1))
        p_std = jnp.std(p, axis=(-2, -1), ddof=1)
        t_std = jnp.std(t, axis=(-2, -1), ddof=1)
        term = ((p_mean - t_mean) ** 2 + (p_std - t_std) ** 2).sum()
        loss = loss + term * (w / p_mean.shape[-1])
    return loss


if __name__ == "__main__":
    key = jax.random.PRNGKey(0)
    ks = jax.random.split(key, 8)

    # Three "style feature" layers (NCHW); the third has unaligned R and S to
    # exercise the in-kernel row masking / full-extent-lane block paths.
    shapes = [(2, 4, 16, 16), (2, 8, 8, 8), (2, 6, 7, 7)]
    targets = [jax.random.normal(ks[i], sh, dtype=jnp.float32)
               for i, sh in enumerate(shapes)]
    preds = [jax.random.normal(ks[3 + i], sh, dtype=jnp.float32)
             for i, sh in enumerate(shapes)]
    weights = [1.0, 0.5, 2.0]

    loss_fn = StyleLossBN(targets, weights)
    loss = jax.block_until_ready(loss_fn(preds))
    ref = jax.block_until_ready(_reference_loss(preds, targets, weights))
    assert np.allclose(np.asarray(loss), np.asarray(ref), rtol=1e-5, atol=1e-5), (
        f"mismatch: pallas={float(loss)} ref={float(ref)}"
    )

    # Extra check: force multiple spatial tiles + a masked partial tail tile
    # (S = 208 with 128-lane blocks) to exercise the column-mask path.
    p_u = jax.random.normal(ks[6], (2, 4, 16, 13), dtype=jnp.float32)
    t_u = jax.random.normal(ks[7], (2, 4, 16, 13), dtype=jnp.float32)
    tm_u = jnp.mean(t_u, axis=(-2, -1))
    ts_u = jnp.std(t_u, axis=(-2, -1), ddof=1)
    got = _style_bn_layer_term(p_u, tm_u, ts_u, max_block_bytes=4096)
    want = (((jnp.mean(p_u, axis=(-2, -1)) - tm_u) ** 2
             + (jnp.std(p_u, axis=(-2, -1), ddof=1) - ts_u) ** 2)).sum()
    got, want = jax.block_until_ready((got, want))
    assert np.allclose(np.asarray(got), np.asarray(want), rtol=1e-5, atol=1e-5), (
        f"masked-tile mismatch: pallas={float(got)} ref={float(want)}"
    )

    print("KERNEL_OK")
</pallas_src>

<mosaic_0001>
module attributes {stable_mosaic.version = 11 : i64} {
  func.func @kernel(%arg0: i32, %arg1: i32, %arg2: memref<8x256xf32, #tpu.memory_space<vmem>>, %arg3: memref<8x1xf32, #tpu.memory_space<vmem>>, %arg4: memref<8x1xf32, #tpu.memory_space<vmem>>, %arg5: memref<8x128xf32, #tpu.memory_space<vmem>>, %arg6: memref<8x1xf32, #tpu.memory_space<vmem>>, %arg7: memref<8x1xf32, #tpu.memory_space<vmem>>) attributes {dimension_semantics = [#tpu.dimension_semantics<parallel>, #tpu.dimension_semantics<arbitrary>], iteration_bounds = array<i64: 1, 1>, scalar_prefetch = 0 : i64, scratch_operands = 2 : i64, tpu.core_type = #tpu.core_type<tc>, window_params = [{transform_indices = @transform_0, window_bounds = array<i64: 8, 256>}, {transform_indices = @transform_1, window_bounds = array<i64: 8, 1>}, {transform_indices = @transform_2, window_bounds = array<i64: 8, 1>}, {transform_indices = @transform_3, window_bounds = array<i64: 8, 128>}]} {
    %c0_i32 = arith.constant 0 : i32
    %0 = arith.cmpi eq, %arg1, %c0_i32 : i32
    %1 = arith.extui %0 : i1 to i32
    %c0_i32_0 = arith.constant 0 : i32
    %2 = arith.cmpi ne, %1, %c0_i32_0 : i32
    scf.if %2 {
      %cst_15 = arith.constant 0.000000e+00 : f32
      %21 = vector.broadcast %cst_15 : f32 to vector<8x1xf32>
      %c0_16 = arith.constant 0 : index
      %c0_17 = arith.constant 0 : index
      %22 = vector.load %arg6[%c0_16, %c0_17] : memref<8x1xf32, #tpu.memory_space<vmem>>, vector<8x1xf32>
      tpu.vector_store %arg6[%c0_16, %c0_17], %21 {strides = array<i32>} : memref<8x1xf32, #tpu.memory_space<vmem>>, vector<8x1xf32>,
      %cst_18 = arith.constant 0.000000e+00 : f32
      %23 = vector.broadcast %cst_18 : f32 to vector<8x1xf32>
      %c0_19 = arith.constant 0 : index
      %c0_20 = arith.constant 0 : index
      %24 = vector.load %arg7[%c0_19, %c0_20] : memref<8x1xf32, #tpu.memory_space<vmem>>, vector<8x1xf32>
      tpu.vector_store %arg7[%c0_19, %c0_20], %23 {strides = array<i32>} : memref<8x1xf32, #tpu.memory_space<vmem>>, vector<8x1xf32>,
    } else {
    }
    %c0 = arith.constant 0 : index
    %c0_1 = arith.constant 0 : index
    %3 = vector.load %arg3[%c0, %c0_1] : memref<8x1xf32, #tpu.memory_space<vmem>>, vector<8x1xf32>
    %c0_2 = arith.constant 0 : index
    %c0_3 = arith.constant 0 : index
    %4 = vector.load %arg2[%c0_2, %c0_3] : memref<8x256xf32, #tpu.memory_space<vmem>>, vector<8x256xf32>
    %5 = vector.broadcast %3 : vector<8x1xf32> to vector<8x256xf32>
    %6 = arith.subf %4, %5 : vector<8x256xf32>
    %c0_4 = arith.constant 0 : index
    %c0_5 = arith.constant 0 : index
    %7 = vector.load %arg6[%c0_4, %c0_5] : memref<8x1xf32, #tpu.memory_space<vmem>>, vector<8x1xf32>
    %cst = arith.constant dense<0.000000e+00> : vector<8xf32>
    %8 = vector.multi_reduction <add>, %6, %cst [1] : vector<8x256xf32> to vector<8xf32>
    %9 = vector.shape_cast %8 : vector<8xf32> to vector<8x1xf32>
    %10 = arith.addf %7, %9 : vector<8x1xf32>
    %c0_6 = arith.constant 0 : index
    %c0_7 = arith.constant 0 : index
    %11 = vector.load %arg6[%c0_6, %c0_7] : memref<8x1xf32, #tpu.memory_space<vmem>>, vector<8x1xf32>
    tpu.vector_store %arg6[%c0_6, %c0_7], %10 {strides = array<i32>} : memref<8x1xf32, #tpu.memory_space<vmem>>, vector<8x1xf32>,
    %c0_8 = arith.constant 0 : index
    %c0_9 = arith.constant 0 : index
    %12 = vector.load %arg7[%c0_8, %c0_9] : memref<8x1xf32, #tpu.memory_space<vmem>>, vector<8x1xf32>
    %13 = arith.mulf %6, %6 : vector<8x256xf32>
    %cst_10 = arith.constant dense<0.000000e+00> : vector<8xf32>
    %14 = vector.multi_reduction <add>, %13, %cst_10 [1] : vector<8x256xf32> to vector<8xf32>
    %15 = vector.shape_cast %14 : vector<8xf32> to vector<8x1xf32>
    %16 = arith.addf %12, %15 : vector<8x1xf32>
    %c0_11 = arith.constant 0 : index
    %c0_12 = arith.constant 0 : index
    %17 = vector.load %arg7[%c0_11, %c0_12] : memref<8x1xf32, #tpu.memory_space<vmem>>, vector<8x1xf32>
    tpu.vector_store %arg7[%c0_11, %c0_12], %16 {strides = array<i32>} : memref<8x1xf32, #tpu.memory_space<vmem>>, vector<8x1xf32>,
    %c0_i32_13 = arith.constant 0 : i32
    %18 = arith.cmpi eq, %arg1, %c0_i32_13 : i32
    %19 = arith.extui %18 : i1 to i32
    %c0_i32_14 = arith.constant 0 : i32
    %20 = arith.cmpi ne, %19, %c0_i32_14 : i32
    scf.if %20 {
      %c0_15 = arith.constant 0 : index
      %c0_16 = arith.constant 0 : index
      %21 = vector.load %arg6[%c0_15, %c0_16] : memref<8x1xf32, #tpu.memory_space<vmem>>, vector<8x1xf32>
      %cst_17 = arith.constant 3.906250e-03 : f32
      %22 = vector.broadcast %cst_17 : f32 to vector<8x1xf32>
      %23 = arith.mulf %21, %22 : vector<8x1xf32>
      %c0_18 = arith.constant 0 : index
      %c0_19 = arith.constant 0 : index
      %24 = vector.load %arg7[%c0_18, %c0_19] : memref<8x1xf32, #tpu.memory_space<vmem>>, vector<8x1xf32>
      %c0_20 = arith.constant 0 : index
      %c0_21 = arith.constant 0 : index
      %25 = vector.load %arg6[%c0_20, %c0_21] : memref<8x1xf32, #tpu.memory_space<vmem>>, vector<8x1xf32>
      %26 = arith.mulf %25, %23 : vector<8x1xf32>
      %27 = arith.subf %24, %26 : vector<8x1xf32>
      %cst_22 = arith.constant 0.00392156886 : f32
      %28 = vector.broadcast %cst_22 : f32 to vector<8x1xf32>
      %29 = arith.mulf %27, %28 : vector<8x1xf32>
      %cst_23 = arith.constant 0.000000e+00 : f32
      %30 = vector.broadcast %cst_23 : f32 to vector<8x1xf32>
      %31 = arith.maximumf %29, %30 : vector<8x1xf32>
      %32 = math.sqrt %31 : vector<8x1xf32>
      %c0_24 = arith.constant 0 : index
      %c0_25 = arith.constant 0 : index
      %33 = vector.load %arg4[%c0_24, %c0_25] : memref<8x1xf32, #tpu.memory_space<vmem>>, vector<8x1xf32>
      %34 = arith.subf %32, %33 : vector<8x1xf32>
      %35 = arith.mulf %23, %23 : vector<8x1xf32>
      %36 = arith.mulf %34, %34 : vector<8x1xf32>
      %37 = arith.addf %35, %36 : vector<8x1xf32>
      %38 = vector.shape_cast %37 : vector<8x1xf32> to vector<1x8x1xf32>
      %cst_26 = arith.constant dense<0.000000e+00> : vector<1xf32>
      %39 = vector.multi_reduction <add>, %38, %cst_26 [1, 2] : vector<1x8x1xf32> to vector<1xf32>
      %40 = vector.shape_cast %39 : vector<1xf32> to vector<1x1x1xf32>
      %41 = vector.extract %40[0, 0, 0] : f32 from vector<1x1x1xf32>
      %42 = vector.broadcast %41 : f32 to vector<1x1xf32>
      %43 = vector.shape_cast %42 : vector<1x1xf32> to vector<1x1xf32>
      %44 = vector.broadcast %43 : vector<1x1xf32> to vector<8x128xf32>
      %c0_27 = arith.constant 0 : index
      %c0_28 = arith.constant 0 : index
      %45 = vector.load %arg5[%c0_27, %c0_28] : memref<8x128xf32, #tpu.memory_space<vmem>>, vector<8x128xf32>
      tpu.vector_store %arg5[%c0_27, %c0_28], %44 {strides = array<i32>} : memref<8x128xf32, #tpu.memory_space<vmem>>, vector<8x128xf32>,
    } else {
    }
    return
  }
  func.func @transform_0(%arg0: i32, %arg1: i32) -> (i32, i32) {
    %c0_i32 = arith.constant 0 : i32
    return %arg0, %arg1 : i32, i32
  }
  func.func @transform_1(%arg0: i32, %arg1: i32) -> (i32, i32) {
    %c0_i32 = arith.constant 0 : i32
    %c0_i32_0 = arith.constant 0 : i32
    return %arg0, %c0_i32 : i32, i32
  }
  func.func @transform_2(%arg0: i32, %arg1: i32) -> (i32, i32) {
    %c0_i32 = arith.constant 0 : i32
    %c0_i32_0 = arith.constant 0 : i32
    return %arg0, %c0_i32 : i32, i32
  }
  func.func @transform_3(%arg0: i32, %arg1: i32) -> (i32, i32) {
    %c0_i32 = arith.constant 0 : i32
    %c0_i32_0 = arith.constant 0 : i32
    return %arg0, %c0_i32 : i32, i32
  }
}

</mosaic_0001>

<bundles_post_ra>
// kernel: tpu_custom_call.1
= control target key start
LH: loop header
LB: loop body
LE: loop exit
PB: predicated region body
PF: predicated region fallthrough
CT: control target
= control target key end

     0   :  { %v136_v1 = vmov 0   ;;  %s179_s0 = inlined_call_operand.vmem [shape: f32[8,256], index: 0, kind: input, shape index: {}]   ;;  %s180_s1 = inlined_call_operand.vmem [shape: f32[8,1], index: 1, kind: input, shape index: {}]   ;;  %s181_s2 = inlined_call_operand.vmem [shape: f32[8,1], index: 2, kind: input, shape index: {}]   ;;  %s182_s3 = inlined_call_operand.hbm [shape: f32[8,128], index: 3, kind: output, shape index: {}]  }
   0x1   :  { %v22_v0 = vld [vmem:[%s180_s1] sm:$0xff]  ;;  %107 = vset.pattern.permute.xlu0 %v136_v1 }
   0x2   :  { %8 = vsyncpa [#allocation5], 0  ;;  %27 = vperm.xlu0 %107, %v22_v0   ;;  %v23_v2 = vld [vmem:[%s179_s0] sm:$0xff]  ;;  %v24_v3 = vld [vmem:[%s179_s0 + $0x8] sm:$0xff]  ;;  %vm19_vm0 = vcmask 7168   ;;  %v137_v11 = vmov 0.0  }
   0x3   :  { %20 = vst.msk [vmem:[#allocation2] sm:$0xff] %vm19_vm0, %v137_v11  ;;  %v69_v33 = vld [vmem:[%s181_s2] sm:$0xff]  ;;  %s138_s18 = smov [#allocation4]   ;;  %s93_s21 = sshll.u32 %s182_s3, 4  ;;  %s94_s21 = int_to_ptr.hbm [resolvable:$true] %s93_s21 }
   0x4   :  { %21 = vst.msk [vmem:[#allocation3] sm:$0xff] %vm19_vm0, %v137_v11  ;;  %s91_s2 = sshll.u32 %s138_s18, 4  ;;  %s92_s2 = int_to_ptr.vmem [resolvable:$true] %s91_s2 }
   0xa   :  { %v32_v12 = vld [vmem:[#allocation2] sm:$0xff] }
   0xb   :  { %v39_v14 = vld [vmem:[#allocation3] sm:$0xff] }
  0x74   :  { %v28_v4 = vpop.permute.xlu0 %27 }
  0x75   :  { %v30_v5 = vsub.f32 %v23_v2, %v28_v4  ;;  %v31_v6 = vsub.f32 %v24_v3, %v28_v4 }
  0x77   :  { %v33_v7 = vadd.f32 %v31_v6, %v30_v5  ;;  %v40_v8 = vmul.f32 %v30_v5, %v30_v5  ;;  %v41_v9 = vmul.f32 %v31_v6, %v31_v6 }
  0x79   :  { %34 = vadd.xlane.f32.xlu0 %v33_v7  ;;  %v42_v10 = vadd.f32 %v41_v9, %v40_v8 }
  0x7b   :  { %43 = vadd.xlane.f32.xlu1 %v42_v10 }
  0xec   :  { %v35_v13 = vpop.xlane.xlu0 %34 }
  0xed   :  { %v36_v15 = vadd.f32 %v35_v13, %v32_v12 }
  0xee   :  { %v44_v16 = vpop.xlane.xlu1 %43 }
  0xef   :  { %38 = vst.msk [vmem:[#allocation2] sm:$0xff] %vm19_vm0, %v36_v15  ;;  %v45_v17 = vadd.f32 %v44_v16, %v39_v14 }
  0xf1   :  { %46 = vst.msk [vmem:[#allocation3] sm:$0xff] %vm19_vm0, %v45_v17 }
  0xf6   :  { %v50_v18 = vld [vmem:[#allocation2] sm:$0xff] }
  0xf7   :  { %v51_v19 = vmul.f32 0.00390625, %v50_v18 }
  0xf8   :  { %v52_v21 = vld [vmem:[#allocation3] sm:$0xff] }
  0xf9   :  { %v53_v20 = vmul.f32 %v51_v19, %v50_v18  ;;  %v71_v37 = vmul.f32 %v51_v19, %v51_v19 }
  0xfb   :  { %v54_v22 = vsub.f32 %v52_v21, %v53_v20 }
  0xfd   :  { %v55_v23 = vmul.f32 0.003921569, %v54_v22 }
  0xff   :  { %v56_v24 = vmax.f32 %v55_v23, 0.0 }
 0x101   :  { %108 = vrsqrt.f32 %v56_v24  ;;  %vm64_vm1 = vcmp.eq.f32.partialorder %v56_v24, inf  ;;  %v67_v32 = vand.u32 2147483648, %v56_v24  ;;  %vm66_vm2 = vcmp.eq.f32.partialorder %v56_v24, 0.0 }
 0x107   :  { %v109_v25 = vpop.eup %108 }
 0x108   :  { %v58_v26 = vmul.f32 %v109_v25, %v56_v24 }
 0x10a   :  { %v59_v27 = vmul.f32 %v109_v25, %v58_v26 }
 0x10c   :  { %v60_v28 = vmul.f32 0.5, %v59_v27 }
 0x10e   :  { %v61_v29 = vsub.f32 1.5, %v60_v28 }
 0x110   :  { %v62_v30 = vmul.f32 %v109_v25, %v61_v29 }
 0x112   :  { %v63_v31 = vmul.f32 %v62_v30, %v56_v24 }
 0x114   :  { %v65_v34 = vsel %vm64_vm1, %v56_v24, %v63_v31 }
 0x115   :  { %v68_v35 = vsel %vm66_vm2, %v67_v32, %v65_v34 }
 0x116   :  { %v70_v36 = vsub.f32 %v68_v35, %v69_v33 }
 0x118   :  { %v72_v38 = vmul.f32 %v70_v36, %v70_v36 }
 0x11a   :  { %v73_v39 = vadd.f32 %v72_v38, %v71_v37 }
 0x11c   :  { %v74_v40 = vsel %vm19_vm0, %v73_v39, 0.0 }
 0x11d   :  { %75 = vadd.xlane.f32.xlu1 %v74_v40 }
 0x190   :  { %v76_v41 = vpop.xlane.xlu1 %75 }
 0x191   :  { %v77_v42 = vrot.slane %v76_v41, 4 }
 0x193   :  { %v78_v43 = vadd.f32 %v77_v42, %v76_v41 }
 0x195   :  { %v79_v44 = vrot.slane %v78_v43, 2 }
 0x197   :  { %v80_v45 = vadd.f32 %v79_v44, %v78_v43 }
 0x199   :  { %v81_v46 = vrot.slane %v80_v45, 1 }
 0x19b   :  { %v82_v47 = vadd.f32 %v81_v46, %v80_v45 }
 0x19d   :  { %102 = vpush %v82_v47 }
 0x1ce   :  { %s103_s22 = spop %102 }
 0x1cf   :  { %v84_v48 = vstv %s103_s22 }
 0x1d0   :  { %85 = vst [vmem:[#allocation4] sm:$0xff] %v84_v48 }
 0x1d1   :  { %96 = dma.vmem_to_hbm [thread:$0]  %s92_s2, 128, %s94_s21, [#allocation5]  }
 0x1d2   :  { %134 = dma.done.wait [#allocation5], 128  }
 0x1d3   :  { %135 = vsyncadd [#allocation5], 4294967168 }
 0x1d4   :  { %101 = vsyncpa [#allocation5], 1 }

</bundles_post_ra>
